<compile_context>
chip_gen: v7x
topology: tpu7x:2x2x1
jax: 0.10.0
libtpu: 0.0.40
codegen_flags: <defaults>
</compile_context>

<pallas_src>
import jax
import jax.numpy as jnp
from jax import lax
from jax.experimental import pallas as pl
from jax.experimental.pallas import tpu as pltpu


def _round_up(x, m):
    return ((x + m - 1) // m) * m


# ------------------------- cross-kernel construction (weight glue) -------------------------

def _build_hv(w5):
    # w5: (Co, Ci, 1, 5) -> Hori/Veri-cross 3x3: [[0,w0,0],[w1,w2,w3],[0,w4,0]]
    Co, Ci = w5.shape[0], w5.shape[1]
    w = w5[:, :, 0, :]
    z = jnp.zeros((Co, Ci), w5.dtype)
    k = jnp.stack([z, w[..., 0], z,
                   w[..., 1], w[..., 2], w[..., 3],
                   z, w[..., 4], z], axis=-1)
    return k.reshape(Co, Ci, 3, 3)


def _build_diag(w5):
    # w5: (Co, Ci, 1, 5) -> Diag-cross 3x3: [[w0,0,w1],[0,w2,0],[w3,0,w4]]
    Co, Ci = w5.shape[0], w5.shape[1]
    w = w5[:, :, 0, :]
    z = jnp.zeros((Co, Ci), w5.dtype)
    k = jnp.stack([w[..., 0], z, w[..., 1],
                   z, w[..., 2], z,
                   w[..., 3], z, w[..., 4]], axis=-1)
    return k.reshape(Co, Ci, 3, 3)


# ------------------------------------ Pallas kernel ------------------------------------

def _make_cdc_kernel(C, H, W, pad_l, hwp):
    HW = H * W

    def kernel(x_ref, w_ref, o_ref, xs_ref):
        # x_ref : (1, C, HW)   unpadded activations for one image (compute dtype, e.g. bf16)
        # w_ref : (9, Co, C)   folded effective per-tap weights (tap-major)
        # o_ref : (1, Co, HW)  output (f32), NCHW-flat -> lane-dense stores
        # xs_ref: (C, HWP)     VMEM scratch: lane-padded flat image
        dt = xs_ref.dtype

        # Zero only the lane-pad regions (cheap; done every step so no cross-step state).
        xs_ref[:, 0:pad_l] = jnp.zeros((C, pad_l), dt)
        xs_ref[:, pad_l + HW:hwp] = jnp.zeros((C, hwp - pad_l - HW), dt)
        # Interior copy at a 128-aligned lane offset.
        xs_ref[:, pad_l:pad_l + HW] = x_ref[0]

        # Column-validity masks (kill the row-wrap artifact of the flattened layout).
        # Hoisted single broadcasts (JAX does not CSE broadcast_in_dim in the unrolled loop).
        col = lax.broadcasted_iota(jnp.int32, (1, HW), 1) % W
        mask_l = jnp.broadcast_to(col > 0, (C, HW)).astype(dt)       # reading w-1 is valid
        mask_r = jnp.broadcast_to(col < W - 1, (C, HW)).astype(dt)   # reading w+1 is valid

        # 9 accumulated small matmuls directly from shifted slices (no im2col patch).
        acc = None
        for ky in range(3):
            for kx in range(3):
                start = pad_l + (ky - 1) * W + (kx - 1)   # static, always in [0, hwp-HW]
                win = xs_ref[:, start:start + HW]         # (C, HW)
                if kx == 0:
                    win = win * mask_l
                elif kx == 2:
                    win = win * mask_r
                t = jnp.dot(w_ref[ky * 3 + kx], win,
                            preferred_element_type=jnp.float32)
                acc = t if acc is None else acc + t

        o_ref[0] = acc.astype(o_ref.dtype)

    return kernel


# --------------------------------------- wrapper ---------------------------------------

def cdcconv_forward(x_nchw, w_h5, w_d5, hp, theta=0.8, compute_dtype=jnp.bfloat16):
    Co, Ci = w_h5.shape[0], w_h5.shape[1]
    B, C, H, W = x_nchw.shape
    # Hard constraint of this fused variant: residual folding needs Cin == Cout.
    assert C == Ci == Co, "cdcconv kernel requires in_channels == out_channels"

    HW = H * W
    pad_l = _round_up(W + 1, 128)               # left lane pad: >= W+1 and 128-aligned
    hwp = _round_up(pad_l + HW + W + 1, 128)    # total padded flat width (multiple of 128)

    # ---- fold theta-diff, sigmoid gate and residual into ONE 3x3 weight set (exact) ----
    kh = _build_hv(w_h5.astype(jnp.float32))
    kd = _build_diag(w_d5.astype(jnp.float32))
    kh = kh.at[:, :, 1, 1].add(-theta * w_h5.sum(axis=(2, 3)))        # - theta * 1x1 diff conv
    kd = kd.at[:, :, 1, 1].add(-theta * w_d5.sum(axis=(2, 3)))
    sig = jax.nn.sigmoid(hp.astype(jnp.float32))[0]
    w_mix = sig * kh + (1.0 - sig) * kd                               # sigmoid-gated mix
    w_mix = w_mix.at[:, :, 1, 1].add(jnp.eye(Co, dtype=w_mix.dtype))  # '+ x' residual
    # (Co, Ci, 3, 3) -> (9, Co, Ci), tap-major; cast once to the compute dtype.
    w_eff = jnp.transpose(w_mix, (2, 3, 0, 1)).reshape(9, Co, Ci).astype(compute_dtype)

    # Activations: NCHW -> (B, C, H*W). No HBM padding; in a real model feed bf16 directly.
    x_flat = x_nchw.reshape(B, C, HW)
    if x_flat.dtype != compute_dtype:
        x_flat = x_flat.astype(compute_dtype)

    itemsize = jnp.dtype(compute_dtype).itemsize
    in_block = C * HW * itemsize
    out_block = Co * HW * 4
    scratch_b = C * hwp * itemsize
    w_bytes = 9 * Co * Ci * itemsize
    vmem_est = 2 * in_block + 2 * out_block + scratch_b + 2 * w_bytes
    vmem_limit = int(max(16 * 2**20, min(64 * 2**20, 4 * vmem_est)))
    # TODO(synk): if 4*vmem_est exceeds ~48 MiB (very large images), add a row-tile grid axis.

    cost = pl.CostEstimate(
        flops=2 * B * Co * Ci * 9 * HW,
        transcendentals=0,
        bytes_accessed=B * in_block + w_bytes + B * out_block,
    )

    out_flat = pl.pallas_call(
        _make_cdc_kernel(C, H, W, pad_l, hwp),
        out_shape=jax.ShapeDtypeStruct((B, Co, HW), jnp.float32),
        grid_spec=pltpu.PrefetchScalarGridSpec(
            num_scalar_prefetch=0,
            grid=(B,),   # B >= 2 gives both v7x TensorCores work under "parallel"
            in_specs=[
                pl.BlockSpec((1, C, HW), lambda b: (b, 0, 0)),
                pl.BlockSpec((9, Co, Ci), lambda b: (0, 0, 0)),
            ],
            out_specs=pl.BlockSpec((1, Co, HW), lambda b: (b, 0, 0)),
            scratch_shapes=[pltpu.VMEM((C, hwp), compute_dtype)],
        ),
        compiler_params=pltpu.CompilerParams(
            dimension_semantics=("parallel",),
            vmem_limit_bytes=vmem_limit,
        ),
        cost_estimate=cost,
    )(x_flat, w_eff)

    return out_flat.reshape(B, Co, H, W)   # already NCHW — no transpose needed


# ------------------------------ pure-JAX reference (check) ------------------------------

def _reference(x, w_h5, w_d5, hp, theta=0.8):
    kh = _build_hv(w_h5)
    kd = _build_diag(w_d5)

    def conv(inp, w, pad):
        return lax.conv_general_dilated(
            inp, w, (1, 1), [(pad, pad), (pad, pad)],
            dimension_numbers=('NCHW', 'OIHW', 'NCHW'))

    kdiff_h = w_h5.sum(axis=(2, 3))[:, :, None, None]
    kdiff_d = w_d5.sum(axis=(2, 3))[:, :, None, None]
    out1 = conv(x, kh, 1) - theta * conv(x, kdiff_h, 0)
    out2 = conv(x, kd, 1) - theta * conv(x, kdiff_d, 0)
    sig = jax.nn.sigmoid(hp)[0]
    return sig * out1 + (1.0 - sig) * out2 + x


# ------------------------------------------ main ------------------------------------------

if __name__ == "__main__":
    key = jax.random.PRNGKey(0)
    k1, k2, k3, k4 = jax.random.split(key, 4)

    B, C, H, W = 2, 4, 16, 16          # in_channels == out_channels (required by the residual)
    theta = 0.8

    x = jax.random.normal(k1, (B, C, H, W), dtype=jnp.float32)

    # Deterministic parameter init (Conv2d kaiming-uniform-style bound, fan_in = C*1*5).
    bound = 1.0 / float((C * 1 * 5) ** 0.5)
    w_h5 = jax.random.uniform(k2, (C, C, 1, 5), jnp.float32, -bound, bound)
    w_d5 = jax.random.uniform(k3, (C, C, 1, 5), jnp.float32, -bound, bound)
    hp = jax.random.normal(k4, (1,), dtype=jnp.float32)   # HP_branch parameter

    out = cdcconv_forward(x, w_h5, w_d5, hp, theta=theta)
    out = jax.block_until_ready(out)

    ref = _reference(x, w_h5, w_d5, hp, theta=theta)
    assert out.shape == ref.shape == (B, C, H, W)
    # bf16 inputs/weights with f32 accumulation -> loosened tolerance (review note).
    assert bool(jnp.allclose(out, ref, atol=5e-2, rtol=5e-2))

    print("KERNEL_OK")
</pallas_src>

<mosaic_0001>
module attributes {stable_mosaic.version = 11 : i64} {
  func.func @kernel(%arg0: i32, %arg1: memref<1x4x256xbf16, #tpu.memory_space<vmem>>, %arg2: memref<9x4x4xbf16, #tpu.memory_space<vmem>>, %arg3: memref<1x4x256xf32, #tpu.memory_space<vmem>>, %arg4: memref<4x512xbf16, #tpu.memory_space<vmem>>) attributes {dimension_semantics = [#tpu.dimension_semantics<parallel>], iteration_bounds = array<i64: 2>, scalar_prefetch = 0 : i64, scratch_operands = 1 : i64, tpu.core_type = #tpu.core_type<tc>, window_params = [{transform_indices = @transform_0, window_bounds = array<i64: 1, 4, 256>}, {pipeline_mode = #tpu.pipeline_mode<synchronous>, transform_indices = @transform_1, window_bounds = array<i64: 9, 4, 4>}, {transform_indices = @transform_2, window_bounds = array<i64: 1, 4, 256>}]} {
    %cst = arith.constant 0.000000e+00 : bf16
    %0 = vector.broadcast %cst : bf16 to vector<4x128xbf16>
    %c0 = arith.constant 0 : index
    %c0_0 = arith.constant 0 : index
    %1 = vector.load %arg4[%c0, %c0_0] : memref<4x512xbf16, #tpu.memory_space<vmem>>, vector<4x128xbf16>
    tpu.vector_store %arg4[%c0, %c0_0], %0 {strides = array<i32>} : memref<4x512xbf16, #tpu.memory_space<vmem>>, vector<4x128xbf16>,
    %cst_1 = arith.constant 0.000000e+00 : bf16
    %2 = vector.broadcast %cst_1 : bf16 to vector<4x128xbf16>
    %c0_2 = arith.constant 0 : index
    %c384 = arith.constant 384 : index
    %3 = vector.load %arg4[%c0_2, %c384] : memref<4x512xbf16, #tpu.memory_space<vmem>>, vector<4x128xbf16>
    tpu.vector_store %arg4[%c0_2, %c384], %2 {strides = array<i32>} : memref<4x512xbf16, #tpu.memory_space<vmem>>, vector<4x128xbf16>,
    %c0_3 = arith.constant 0 : index
    %c0_4 = arith.constant 0 : index
    %c0_5 = arith.constant 0 : index
    %4 = vector.load %arg1[%c0_3, %c0_4, %c0_5] : memref<1x4x256xbf16, #tpu.memory_space<vmem>>, vector<1x4x256xbf16>
    %5 = vector.shape_cast %4 : vector<1x4x256xbf16> to vector<4x256xbf16>
    %c0_6 = arith.constant 0 : index
    %c128 = arith.constant 128 : index
    %6 = vector.load %arg4[%c0_6, %c128] : memref<4x512xbf16, #tpu.memory_space<vmem>>, vector<4x256xbf16>
    tpu.vector_store %arg4[%c0_6, %c128], %5 {strides = array<i32>} : memref<4x512xbf16, #tpu.memory_space<vmem>>, vector<4x256xbf16>,
    %7 = tpu.iota {dimensions = array<i32: 1>} : vector<1x256xi32>
    %c16_i32 = arith.constant 16 : i32
    %c0_i32 = arith.constant 0 : i32
    %8 = arith.cmpi eq, %c16_i32, %c0_i32 : i32
    %c1_i32 = arith.constant 1 : i32
    %9 = arith.select %8, %c1_i32, %c16_i32 : i32
    %10 = vector.broadcast %9 : i32 to vector<1x256xi32>
    %11 = arith.remsi %7, %10 : vector<1x256xi32>
    %c0_i32_7 = arith.constant 0 : i32
    %12 = vector.broadcast %c0_i32_7 : i32 to vector<1x256xi32>
    %13 = arith.cmpi ne, %11, %12 : vector<1x256xi32>
    %c0_i32_8 = arith.constant 0 : i32
    %14 = vector.broadcast %c0_i32_8 : i32 to vector<1x256xi32>
    %15 = arith.cmpi slt, %11, %14 : vector<1x256xi32>
    %c0_i32_9 = arith.constant 0 : i32
    %16 = arith.cmpi slt, %9, %c0_i32_9 : i32
    %17 = vector.broadcast %16 : i1 to vector<1x256xi1>
    %18 = vector.broadcast %17 : vector<1x256xi1> to vector<1x256xi1>
    %19 = arith.xori %15, %18 : vector<1x256xi1>
    %20 = arith.andi %19, %13 : vector<1x256xi1>
    %21 = vector.broadcast %9 : i32 to vector<1x256xi32>
    %22 = arith.addi %11, %21 : vector<1x256xi32>
    %23 = arith.select %20, %22, %11 : vector<1x256xi1>, vector<1x256xi32>
    %c0_i32_10 = arith.constant 0 : i32
    %24 = vector.broadcast %c0_i32_10 : i32 to vector<1x256xi32>
    %25 = arith.cmpi sgt, %23, %24 : vector<1x256xi32>
    %26 = vector.shape_cast %25 : vector<1x256xi1> to vector<1x256xi1>
    %27 = vector.broadcast %26 : vector<1x256xi1> to vector<4x256xi1>
    %28 = arith.extui %27 : vector<4x256xi1> to vector<4x256xi32>
    %29 = arith.sitofp %28 : vector<4x256xi32> to vector<4x256xf32>
    %30 = arith.truncf %29 : vector<4x256xf32> to vector<4x256xbf16>
    %c15_i32 = arith.constant 15 : i32
    %31 = vector.broadcast %c15_i32 : i32 to vector<1x256xi32>
    %32 = arith.cmpi slt, %23, %31 : vector<1x256xi32>
    %33 = vector.shape_cast %32 : vector<1x256xi1> to vector<1x256xi1>
    %34 = vector.broadcast %33 : vector<1x256xi1> to vector<4x256xi1>
    %35 = arith.extui %34 : vector<4x256xi1> to vector<4x256xi32>
    %36 = arith.sitofp %35 : vector<4x256xi32> to vector<4x256xf32>
    %37 = arith.truncf %36 : vector<4x256xf32> to vector<4x256xbf16>
    %c0_11 = arith.constant 0 : index
    %c111 = arith.constant 111 : index
    %38 = vector.load %arg4[%c0_11, %c111] : memref<4x512xbf16, #tpu.memory_space<vmem>>, vector<4x256xbf16>
    %39 = arith.mulf %38, %30 : vector<4x256xbf16>
    %c0_12 = arith.constant 0 : index
    %c0_13 = arith.constant 0 : index
    %c0_14 = arith.constant 0 : index
    %40 = vector.load %arg2[%c0_12, %c0_13, %c0_14] : memref<9x4x4xbf16, #tpu.memory_space<vmem>>, vector<1x4x4xbf16>
    %41 = vector.shape_cast %40 : vector<1x4x4xbf16> to vector<4x4xbf16>
    %cst_15 = arith.constant dense<0.000000e+00> : vector<4x256xf32>
    %42 = tpu.matmul %41, %39, %cst_15 {dimension_numbers = #tpu.dot_dimension_numbers<[1], [0], [0], [1], [0, 0, 1, 1], [], []>} : vector<4x4xbf16>, vector<4x256xbf16>, vector<4x256xf32> -> vector<4x256xf32>
    %c0_16 = arith.constant 0 : index
    %c112 = arith.constant 112 : index
    %43 = vector.load %arg4[%c0_16, %c112] : memref<4x512xbf16, #tpu.memory_space<vmem>>, vector<4x256xbf16>
    %c1 = arith.constant 1 : index
    %c0_17 = arith.constant 0 : index
    %c0_18 = arith.constant 0 : index
    %44 = vector.load %arg2[%c1, %c0_17, %c0_18] : memref<9x4x4xbf16, #tpu.memory_space<vmem>>, vector<1x4x4xbf16>
    %45 = vector.shape_cast %44 : vector<1x4x4xbf16> to vector<4x4xbf16>
    %cst_19 = arith.constant dense<0.000000e+00> : vector<4x256xf32>
    %46 = tpu.matmul %45, %43, %cst_19 {dimension_numbers = #tpu.dot_dimension_numbers<[1], [0], [0], [1], [0, 0, 1, 1], [], []>} : vector<4x4xbf16>, vector<4x256xbf16>, vector<4x256xf32> -> vector<4x256xf32>
    %47 = arith.addf %42, %46 : vector<4x256xf32>
    %c0_20 = arith.constant 0 : index
    %c113 = arith.constant 113 : index
    %48 = vector.load %arg4[%c0_20, %c113] : memref<4x512xbf16, #tpu.memory_space<vmem>>, vector<4x256xbf16>
    %49 = arith.mulf %48, %37 : vector<4x256xbf16>
    %c2 = arith.constant 2 : index
    %c0_21 = arith.constant 0 : index
    %c0_22 = arith.constant 0 : index
    %50 = vector.load %arg2[%c2, %c0_21, %c0_22] : memref<9x4x4xbf16, #tpu.memory_space<vmem>>, vector<1x4x4xbf16>
    %51 = vector.shape_cast %50 : vector<1x4x4xbf16> to vector<4x4xbf16>
    %cst_23 = arith.constant dense<0.000000e+00> : vector<4x256xf32>
    %52 = tpu.matmul %51, %49, %cst_23 {dimension_numbers = #tpu.dot_dimension_numbers<[1], [0], [0], [1], [0, 0, 1, 1], [], []>} : vector<4x4xbf16>, vector<4x256xbf16>, vector<4x256xf32> -> vector<4x256xf32>
    %53 = arith.addf %47, %52 : vector<4x256xf32>
    %c0_24 = arith.constant 0 : index
    %c127 = arith.constant 127 : index
    %54 = vector.load %arg4[%c0_24, %c127] : memref<4x512xbf16, #tpu.memory_space<vmem>>, vector<4x256xbf16>
    %55 = arith.mulf %54, %30 : vector<4x256xbf16>
    %c3 = arith.constant 3 : index
    %c0_25 = arith.constant 0 : index
    %c0_26 = arith.constant 0 : index
    %56 = vector.load %arg2[%c3, %c0_25, %c0_26] : memref<9x4x4xbf16, #tpu.memory_space<vmem>>, vector<1x4x4xbf16>
    %57 = vector.shape_cast %56 : vector<1x4x4xbf16> to vector<4x4xbf16>
    %cst_27 = arith.constant dense<0.000000e+00> : vector<4x256xf32>
    %58 = tpu.matmul %57, %55, %cst_27 {dimension_numbers = #tpu.dot_dimension_numbers<[1], [0], [0], [1], [0, 0, 1, 1], [], []>} : vector<4x4xbf16>, vector<4x256xbf16>, vector<4x256xf32> -> vector<4x256xf32>
    %59 = arith.addf %53, %58 : vector<4x256xf32>
    %c0_28 = arith.constant 0 : index
    %c128_29 = arith.constant 128 : index
    %60 = vector.load %arg4[%c0_28, %c128_29] : memref<4x512xbf16, #tpu.memory_space<vmem>>, vector<4x256xbf16>
    %c4 = arith.constant 4 : index
    %c0_30 = arith.constant 0 : index
    %c0_31 = arith.constant 0 : index
    %61 = vector.load %arg2[%c4, %c0_30, %c0_31] : memref<9x4x4xbf16, #tpu.memory_space<vmem>>, vector<1x4x4xbf16>
    %62 = vector.shape_cast %61 : vector<1x4x4xbf16> to vector<4x4xbf16>
    %cst_32 = arith.constant dense<0.000000e+00> : vector<4x256xf32>
    %63 = tpu.matmul %62, %60, %cst_32 {dimension_numbers = #tpu.dot_dimension_numbers<[1], [0], [0], [1], [0, 0, 1, 1], [], []>} : vector<4x4xbf16>, vector<4x256xbf16>, vector<4x256xf32> -> vector<4x256xf32>
    %64 = arith.addf %59, %63 : vector<4x256xf32>
    %c0_33 = arith.constant 0 : index
    %c129 = arith.constant 129 : index
    %65 = vector.load %arg4[%c0_33, %c129] : memref<4x512xbf16, #tpu.memory_space<vmem>>, vector<4x256xbf16>
    %66 = arith.mulf %65, %37 : vector<4x256xbf16>
    %c5 = arith.constant 5 : index
    %c0_34 = arith.constant 0 : index
    %c0_35 = arith.constant 0 : index
    %67 = vector.load %arg2[%c5, %c0_34, %c0_35] : memref<9x4x4xbf16, #tpu.memory_space<vmem>>, vector<1x4x4xbf16>
    %68 = vector.shape_cast %67 : vector<1x4x4xbf16> to vector<4x4xbf16>
    %cst_36 = arith.constant dense<0.000000e+00> : vector<4x256xf32>
    %69 = tpu.matmul %68, %66, %cst_36 {dimension_numbers = #tpu.dot_dimension_numbers<[1], [0], [0], [1], [0, 0, 1, 1], [], []>} : vector<4x4xbf16>, vector<4x256xbf16>, vector<4x256xf32> -> vector<4x256xf32>
    %70 = arith.addf %64, %69 : vector<4x256xf32>
    %c0_37 = arith.constant 0 : index
    %c143 = arith.constant 143 : index
    %71 = vector.load %arg4[%c0_37, %c143] : memref<4x512xbf16, #tpu.memory_space<vmem>>, vector<4x256xbf16>
    %72 = arith.mulf %71, %30 : vector<4x256xbf16>
    %c6 = arith.constant 6 : index
    %c0_38 = arith.constant 0 : index
    %c0_39 = arith.constant 0 : index
    %73 = vector.load %arg2[%c6, %c0_38, %c0_39] : memref<9x4x4xbf16, #tpu.memory_space<vmem>>, vector<1x4x4xbf16>
    %74 = vector.shape_cast %73 : vector<1x4x4xbf16> to vector<4x4xbf16>
    %cst_40 = arith.constant dense<0.000000e+00> : vector<4x256xf32>
    %75 = tpu.matmul %74, %72, %cst_40 {dimension_numbers = #tpu.dot_dimension_numbers<[1], [0], [0], [1], [0, 0, 1, 1], [], []>} : vector<4x4xbf16>, vector<4x256xbf16>, vector<4x256xf32> -> vector<4x256xf32>
    %76 = arith.addf %70, %75 : vector<4x256xf32>
    %c0_41 = arith.constant 0 : index
    %c144 = arith.constant 144 : index
    %77 = vector.load %arg4[%c0_41, %c144] : memref<4x512xbf16, #tpu.memory_space<vmem>>, vector<4x256xbf16>
    %c7 = arith.constant 7 : index
    %c0_42 = arith.constant 0 : index
    %c0_43 = arith.constant 0 : index
    %78 = vector.load %arg2[%c7, %c0_42, %c0_43] : memref<9x4x4xbf16, #tpu.memory_space<vmem>>, vector<1x4x4xbf16>
    %79 = vector.shape_cast %78 : vector<1x4x4xbf16> to vector<4x4xbf16>
    %cst_44 = arith.constant dense<0.000000e+00> : vector<4x256xf32>
    %80 = tpu.matmul %79, %77, %cst_44 {dimension_numbers = #tpu.dot_dimension_numbers<[1], [0], [0], [1], [0, 0, 1, 1], [], []>} : vector<4x4xbf16>, vector<4x256xbf16>, vector<4x256xf32> -> vector<4x256xf32>
    %81 = arith.addf %76, %80 : vector<4x256xf32>
    %c0_45 = arith.constant 0 : index
    %c145 = arith.constant 145 : index
    %82 = vector.load %arg4[%c0_45, %c145] : memref<4x512xbf16, #tpu.memory_space<vmem>>, vector<4x256xbf16>
    %83 = arith.mulf %82, %37 : vector<4x256xbf16>
    %c8 = arith.constant 8 : index
    %c0_46 = arith.constant 0 : index
    %c0_47 = arith.constant 0 : index
    %84 = vector.load %arg2[%c8, %c0_46, %c0_47] : memref<9x4x4xbf16, #tpu.memory_space<vmem>>, vector<1x4x4xbf16>
    %85 = vector.shape_cast %84 : vector<1x4x4xbf16> to vector<4x4xbf16>
    %cst_48 = arith.constant dense<0.000000e+00> : vector<4x256xf32>
    %86 = tpu.matmul %85, %83, %cst_48 {dimension_numbers = #tpu.dot_dimension_numbers<[1], [0], [0], [1], [0, 0, 1, 1], [], []>} : vector<4x4xbf16>, vector<4x256xbf16>, vector<4x256xf32> -> vector<4x256xf32>
    %87 = arith.addf %81, %86 : vector<4x256xf32>
    %c0_49 = arith.constant 0 : index
    %c0_50 = arith.constant 0 : index
    %c0_51 = arith.constant 0 : index
    %88 = vector.load %arg3[%c0_49, %c0_50, %c0_51] : memref<1x4x256xf32, #tpu.memory_space<vmem>>, vector<1x4x256xf32>
    %89 = vector.shape_cast %88 : vector<1x4x256xf32> to vector<4x256xf32>
    %90 = vector.shape_cast %87 : vector<4x256xf32> to vector<1x4x256xf32>
    tpu.vector_store %arg3[%c0_49, %c0_50, %c0_51], %90 {strides = array<i32>} : memref<1x4x256xf32, #tpu.memory_space<vmem>>, vector<1x4x256xf32>,
    return
  }
  func.func @transform_0(%arg0: i32) -> (i32, i32, i32) {
    %c0_i32 = arith.constant 0 : i32
    %c0_i32_0 = arith.constant 0 : i32
    %c0_i32_1 = arith.constant 0 : i32
    return %arg0, %c0_i32, %c0_i32_0 : i32, i32, i32
  }
  func.func @transform_1(%arg0: i32) -> (i32, i32, i32) {
    %c0_i32 = arith.constant 0 : i32
    %c0_i32_0 = arith.constant 0 : i32
    %c0_i32_1 = arith.constant 0 : i32
    %c0_i32_2 = arith.constant 0 : i32
    return %c0_i32, %c0_i32_0, %c0_i32_1 : i32, i32, i32
  }
  func.func @transform_2(%arg0: i32) -> (i32, i32, i32) {
    %c0_i32 = arith.constant 0 : i32
    %c0_i32_0 = arith.constant 0 : i32
    %c0_i32_1 = arith.constant 0 : i32
    return %arg0, %c0_i32, %c0_i32_0 : i32, i32, i32
  }
}

</mosaic_0001>

<bundles_post_ra>
// kernel: tpu_custom_call.1
= control target key start
LH: loop header
LB: loop body
LE: loop exit
PB: predicated region body
PF: predicated region fallthrough
CT: control target
= control target key end

     0   :  { %7 = vsyncpa [#allocation4], 0  ;;  %s1490_s0 = inlined_call_operand.vmem [shape: bf16[2,4,256], index: 0, kind: input, shape index: {}]   ;;  %s1491_s1 = inlined_call_operand.vmem [shape: bf16[9,4,4], index: 1, kind: input, shape index: {}]   ;;  %s1492_s2 = inlined_call_operand.hbm [shape: f32[2,4,256], index: 2, kind: output, shape index: {}]  }
   0x1   :  { %9 = vsyncpa [#allocation4 + $0x1], 0  ;;  %s1261_s9 = smov 0   ;;  %s1263_s10 = smov 0  }
   0x2   :  { %s1265_s11 = smov 0   ;;  %s1267_s12 = smov 0  }
   0x3 LB: > { %s1282_s13 = sadd.s32 4294967295, %s1232_s12   ;;  %s1041_s14 = sadd.s32 4294967294, %s1232_s12   ;;  %s1232_s12 = sphi %s1267_s12, %s1498_s12   ;;  %s1228_s11 = sphi %s1265_s11, %s1497_s11   ;;  %s1224_s10 = sphi %s1263_s10, %s1496_s10   ;;  %s1220_s9 = sphi %s1261_s9, %s1495_s9  }
   0x4   : > { %s1286_s15 = sadd.s32 1, %s1232_s12   ;;  %s69_s16 = sadd.s32 1, %s1228_s11 }
   0x5   : > { %s66_s17 = ssub.s32 %s1232_s12, %s1286_s15  ;;  %p79_p0 = scmp.ne.s32.totalorder %s1228_s11, %s1224_s10 }
   0x6   : > { %p67_p1 = scmp.eq.s32.totalorder %s66_s17, 0  ;;  %p80_p2 = scmp.eq.s32.totalorder %s1282_s13, 1 }
   0x7   : > { %p85_p3 = scmp.ne.s32.totalorder %s1224_s10, %s1220_s9  ;;  %p86_p4 = scmp.eq.s32.totalorder %s1041_s14, 1 }
   0x8   : > { %s1297_s18 = scalar_select %p67_p1, %s1228_s11, %s69_s16  }
   0x9   : > { %p1299_p5 = por %p80_p2, %p79_p0  ;;  %p1303_p6 = por %p86_p4, %p85_p3 }
   0xa   : > { %p1044_p7 = scmp.ge.s32.totalorder %s1232_s12, 1  ;;  %p115_p8 = scmp.lt.s32.totalorder %s1232_s12, 3 }
   0xc   : > { %p116_p9 = pnand %p1044_p7, %p115_p8 }
   0xd   : > { %v147_v0 = vlaneseq (!%p116_p9)  ;;  %v1234_v1 = vmov (!%p116_p9), 1983009808   ;;  %v1235_v4 = vmov (!%p116_p9), 0   ;;  %p137_p10 = scmp.lt.s32.totalorder (!%p116_p9), %s1282_s13, 1  ;;  %v1236_v10 = vmov (!%p116_p9), 0.0   ;;  %s1237_s26 = smov (!%p116_p9), 1  }
   0xe   : > { %119 = sbr.rel (%p116_p9) target bundleno = 540 (0x21c), region = 28  ;;  %v203_v2 = vunpack.c.l.s4 (!%p116_p9), %v1234_v1  ;;  %144 = vst [vmem:[#allocation2 + $0x6] sm:$0x3] (!%p116_p9), %v1235_v4  ;;  %143 = vst [vmem:[#allocation2] sm:$0x3] (!%p116_p9), %v1235_v4  ;;  %612 = vmatprep.mubr.bf16.mxu0 (!%p116_p9), %v1235_v4  ;;  %288 = vmatprep.mubr.bf16.mxu1 (!%p116_p9), %v1235_v4  ;;  %s1238_s27 = smov (!%p116_p9), 15  }
   0xf   : > { %v148_v3 = vand.u32 (!%p116_p9), 127, %v147_v0  ;;  %v206_v8 = vshrl.u32 (!%p116_p9), %v147_v0, 7  ;;  %s1239_s28 = smov (!%p116_p9), 111   ;;  %s1240_s29 = smov (!%p116_p9), 113   ;;  %vm249_vm4 = vcmask (!%p116_p9), 1041408   ;;  %vm245_vm5 = vcmask (!%p116_p9), 31744  }
  0x10   : > { %v204_v7 = vunpack.c.0.s8 (!%p116_p9), %v203_v2  ;;  %s1241_s30 = smov (!%p116_p9), 17   ;;  %s1242_s3 = smov (!%p116_p9), 127   ;;  %v1065_v29 = vld [vmem:[%s1491_s1 + $0x8] sm:$0x3] (!%p116_p9)  ;;  %vm504_vm6 = vcmask (!%p116_p9), 7168   ;;  %vm416_vm7 = vcmask (!%p116_p9), 121856  }
  0x11   : > { %v149_v5 = vadd.s32 (!%p116_p9), 128, %v148_v3  ;;  %v154_v6 = vand.u32 (!%p116_p9), 15, %v148_v3  ;;  %s1243_s4 = smov (!%p116_p9), 16   ;;  %vm212_vm8 = vcmask (!%p116_p9), 908288   ;;  %vm242_vm9 = vcmask (!%p116_p9), 130048   ;;  %s1244_s14 = smov (!%p116_p9), 112  }
  0x12   : > { %v1315_v13 = vsub.s32 (!%p116_p9), %v204_v7, %v206_v8  ;;  %vm387_vm10 = vcmask (!%p116_p9), 924672   ;;  %vm475_vm11 = vcmask (!%p116_p9), 1039360   ;;  %vm320_vm12 = vcmask (!%p116_p9), 138240   ;;  %s134_s5 = sand.u32 (!%p116_p9), 1, %s1224_s10   ;;  %s1087_s7 = sshll.u32 (!%p116_p9), %s1282_s13, 7 }
  0x13   : > { %v161_v9 = vand.u32 (!%p116_p9), 15, %v149_v5  ;;  %vm186_vm0 = vcmp.lt.s32.totalorder (!%p116_p9), %v154_v6, 15  ;;  %vm174_vm1 = vcmp.gt.s32.totalorder (!%p116_p9), %v154_v6, 0  ;;  %v1053_v5 = vld [vmem:[%s1491_s1 + $0x2] sm:$0x3] (!%p116_p9)  ;;  %vm821_vm13 = vcmask (!%p116_p9), 916480  }
  0x14   : > { %v1050_v11 = vsel (!%p116_p9), %vm186_vm0, 1.0, %v1236_v10  ;;  %v1048_v12 = vsel (!%p116_p9), %vm174_vm1, 1.0, %v1236_v10  ;;  %s1045_s6 = sshll.u32 (!%p116_p9), %s134_s5, 3  ;;  %s1245_s23 = smov (!%p116_p9), [#allocation3]  }
  0x15   : > { %s138_s21 = scalar_select %p137_p10, %s1282_s13, 1  ;;  %vm187_vm2 = vcmp.lt.s32.totalorder %v161_v9, 15  ;;  %vm175_vm3 = vcmp.gt.s32.totalorder %v161_v9, 0 }
  0x16   : > { %v1051_v14 = vsel %vm187_vm2, 1.0, %v1236_v10  ;;  %v1049_v15 = vsel %vm175_vm3, 1.0, %v1236_v10  ;;  %s136_s8 = scalar_lea.vmem [#allocation3], %s1045_s6  ;;  %s968_s13 = scalar_lea.sflag [#allocation4], %s134_s5 }
  0x17   : > { %s1086_s22 = sshll.u32 %s138_s21, 2  ;;  %v1058_v17 = vpack.c.bf16 %v1051_v14, %v1050_v11  ;;  %v1052_v18 = vpack.c.bf16 %v1049_v15, %v1048_v12  ;;  %s1448_s21 = scalar_lea.hbm %s1492_s2, %s1087_s7 }
  0x18   : > { %s141_s25 = scalar_lea.vmem %s1490_s0, %s1086_s22  ;;  %s1174_s24 = sshll.u32 %s1245_s23, 4  ;;  %s1175_s24 = int_to_ptr.vmem [resolvable:$false] %s1174_s24 }
  0x19   : > { %v145_v16 = vld [vmem:[%s141_s25] sm:$0xf]  ;;  %v383_v19 = vrot.slane %v1058_v17, %v1315_v13  ;;  %v208_v20 = vrot.slane %v1052_v18, %v1315_v13  ;;  %s1176_s25 = scalar_lea.vmem %s1175_s24, 256 }
  0x1a   : > { %146 = vst [vmem:[#allocation2 + $0x2] sm:$0xf] %v145_v16 }
  0x1b   : > { %624 = vrot.lane.b32.xlu0 %v383_v19, %s1237_s26  ;;  %710 = vrot.lane.b32.xlu1 %v208_v20, %s1238_s27 }
  0x1f   : > { %209 = vrot.lane.b32.xlu0 %v208_v20, %s1239_s28  ;;  %384 = vrot.lane.b32.xlu1 %v383_v19, %s1240_s29 }
  0x21   : > { %v198_v21 = vld [vmem:[#allocation2] sm:$0x3f] }
  0x22   : > { %v227_v22 = vrot.slane %v198_v21, %v1315_v13  ;;  %v220_v24 = vcombine.high %v198_v21, %v198_v21  ;;  %v1066_v26 = vld.sshfl [vmem:[#allocation2 + $0x2] sm:$0x33 pattern:$0x76325410] }
  0x23   : > { %877 = vrot.lane.b32.xlu1 %v383_v19, %s1241_s30  ;;  %472 = vrot.lane.b32.xlu0 %v208_v20, %s1242_s3  ;;  %v570_v27 = vcombine.high %v1066_v26, %v1066_v26  ;;  %v575_v28 = vsel %vm249_vm4, %v1066_v26, 0  ;;  %v623_v32 = vld [vmem:[#allocation2 + $0x2] sm:$0x3f] }
  0x24   : > { %v235_v23 = vcombine.high %v227_v22, %v227_v22  ;;  %v234_v25 = vrot.slane %v220_v24, %v1315_v13  ;;  %v709_v42 = vld [vmem:[#allocation2 + $0x2] sm:$0x3f] }
  0x25   : > { %1067 = vmatprep.subr.msk.bf16.mxu0 %vm249_vm4, %v570_v27  ;;  %v373_v58 = vld [vmem:[#allocation2] sm:$0x3f] }
  0x26   : > { %581 = vmatpush1.bf16.msra.mxu0 %v575_v28  ;;  %v795_v3 = vld [vmem:[#allocation2 + $0x2] sm:$0x3f] }
  0x27   : > { %236 = vrot.lane.b32.xlu0 %v227_v22, %s1243_s4  ;;  %238 = vrot.lane.b32.xlu1 %v235_v23, %s1243_s4  ;;  %v806_v9 = vrot.slane %v795_v3, %v1315_v13  ;;  %v799_v11 = vcombine.high %v795_v3, %v795_v3  ;;  %v471_v15 = vld [vmem:[#allocation2] sm:$0x3f]  ;;  %v1075_v3 = vld [vmem:[%s1491_s1 + $0xe] sm:$0x3] }
  0x28   : > { %v876_v20 = vld [vmem:[#allocation2 + $0x2] sm:$0x3f] }
  0x29   : > { %1068 = vmatmul.mubr.msk.bf16.vlgmr.msra.gmra.mrb[0].mxu0 %vm245_vm5, %v1065_v29  ;;  %v814_v12 = vcombine.high %v806_v9, %v806_v9  ;;  %v813_v18 = vrot.slane %v799_v11, %v1315_v13 }
  0x2a   : > { %698 = vmatprep.mubr.bf16.mxu0 %v1235_v4 }
  0x2b   : > { %240 = vrot.lane.b32.xlu0 %v234_v25, %s1243_s4 }
  0x8d   : > { %v625_v30 = vpop.permute.xlu0 %624  ;;  %v711_v31 = vpop.permute.xlu1 %710 }
  0x8e   : > { %v626_v33 = vrot.slane %v625_v30, 6  ;;  %v712_v35 = vrot.slane %v711_v31, 6 }
  0x90   : > { %v627_v34 = vsel %vm504_vm6, %v626_v33, %v625_v30  ;;  %v713_v43 = vsel %vm416_vm7, %v712_v35, %v711_v31 }
  0x91   : > { %v629_v36 = vmul.bf16 %v627_v34, %v623_v32  ;;  %v210_v37 = vpop.permute.xlu0 %209  ;;  %v385_v38 = vpop.permute.xlu1 %384  ;;  %v715_v49 = vmul.bf16 %v713_v43, %v709_v42 }
  0x92   : > { %v211_v39 = vrot.slane %v210_v37, 6  ;;  %v386_v52 = vrot.slane %v385_v38, 6 }
  0x93   : > { %v633_v40 = vcombine.high %v629_v36, %v629_v36  ;;  %v640_v41 = vrot.slane %v629_v36, %v1315_v13  ;;  %v726_v57 = vrot.slane %v715_v49, %v1315_v13  ;;  %v719_v0 = vcombine.high %v715_v49, %v715_v49 }
  0x94   : > { %v213_v44 = vsel %vm212_vm8, %v211_v39, %v210_v37  ;;  %v388_v59 = vsel %vm387_vm10, %v386_v52, %v385_v38 }
  0x95   : > { %v215_v45 = vmul.bf16 %v213_v44, %v198_v21  ;;  %649 = vrot.lane.b32.xlu1 %v640_v41, %s1242_s3  ;;  %v648_v46 = vcombine.high %v640_v41, %v640_v41  ;;  %v878_v47 = vpop.permute.xlu1 %877  ;;  %v473_v48 = vpop.permute.xlu0 %472  ;;  %v647_v50 = vrot.slane %v633_v40, %v1315_v13  ;;  %v390_v1 = vmul.bf16 %v388_v59, %v373_v58  ;;  %v1069_v40 = vld [vmem:[%s1491_s1 + $0xa] sm:$0x3] }
  0x96   : > { %v734_v6 = vcombine.high %v726_v57, %v726_v57  ;;  %v733_v7 = vrot.slane %v719_v0, %v1315_v13  ;;  %v474_v10 = vrot.slane %v473_v48, 6  ;;  %v879_v14 = vrot.slane %v878_v47, 6 }
  0x97   : > { %651 = vrot.lane.b32.xlu0 %v648_v46, %s1242_s3  ;;  %v305_v51 = vrot.slane %v215_v45, %v1315_v13  ;;  %v298_v53 = vcombine.high %v215_v45, %v215_v45  ;;  %v401_v8 = vrot.slane %v390_v1, %v1315_v13  ;;  %v394_v17 = vcombine.high %v390_v1, %v390_v1 }
  0x98   : > { %v476_v16 = vsel %vm475_vm11, %v474_v10, %v473_v48  ;;  %v880_v21 = vsel %vm320_vm12, %v879_v14, %v878_v47  ;;  %v216_v48 = vld [vmem:[%s1491_s1] sm:$0x3] }
  0x99   : > { %653 = vrot.lane.b32.xlu1 %v647_v50, %s1242_s3  ;;  %v237_v54 = vpop.permute.xlu0 %236  ;;  %v239_v55 = vpop.permute.xlu1 %238  ;;  %v312_v60 = vrot.slane %v298_v53, %v1315_v13  ;;  %v313_v2 = vcombine.high %v305_v51, %v305_v51  ;;  %v478_v19 = vmul.bf16 %v476_v16, %v471_v15  ;;  %v408_v22 = vrot.slane %v394_v17, %v1315_v13  ;;  %v1072_v53 = vld [vmem:[%s1491_s1 + $0xc] sm:$0x3]  ;;  %v1062_v16 = vld [vmem:[%s1491_s1 + $0x6] sm:$0x3]  ;;  %v1078_v17 = vld [vmem:[%s1491_s1 + $0x10] sm:$0x3] }
  0x9a   : > { %v243_v56 = vsel %vm242_vm9, %v237_v54, %v239_v55  ;;  %v882_v23 = vmul.bf16 %v880_v21, %v876_v20  ;;  %v409_v24 = vcombine.high %v401_v8, %v401_v8 }
  0x9b   : > { %314 = vrot.lane.b32.xlu0 %v305_v51, %s1241_s30  ;;  %v251_v62 = vsel %vm249_vm4, %v243_v56, 0  ;;  %v489_v25 = vrot.slane %v478_v19, %v1315_v13  ;;  %v482_v26 = vcombine.high %v478_v19, %v478_v19 }
  0x9c   : > { %v893_v27 = vrot.slane %v882_v23, %v1315_v13  ;;  %v886_v29 = vcombine.high %v882_v23, %v882_v23 }
  0x9d   : > { %735 = vrot.lane.b32.xlu1 %v726_v57, %s1240_s29  ;;  %v241_v61 = vpop.permute.xlu0 %240  ;;  %v496_v28 = vrot.slane %v482_v26, %v1315_v13  ;;  %v497_v30 = vcombine.high %v489_v25, %v489_v25 }
  0x9e   : > { %v244_v63 = vsel %vm242_vm9, %v239_v55, %v241_v61  ;;  %v901_v31 = vcombine.high %v893_v27, %v893_v27  ;;  %v900_v32 = vrot.slane %v886_v29, %v1315_v13 }
  0x9f   : > { %318 = vrot.lane.b32.xlu0 %v312_v60, %s1241_s30  ;;  %1054 = vmatprep.subr.msk.bf16.mxu1 %vm249_vm4, %v244_v63 }
  0xa0   : > { %257 = vmatpush1.bf16.msra.mxu1 %v251_v62 }
  0xa1   : > { %316 = vrot.lane.b32.xlu1 %v313_v2, %s1241_s30  ;;  %v1059_v2 = vld [vmem:[%s1491_s1 + $0x4] sm:$0x3] }
  0xa3   : > { %737 = vrot.lane.b32.xlu0 %v734_v6, %s1240_s29  ;;  %1055 = vmatmul.mubr.msk.bf16.vlgmr.msra.gmra.mrb[0].mxu1 %vm245_vm5, %v1053_v5 }
  0xa4   : > { %364 = vmatprep.mubr.bf16.mxu1 %v1235_v4 }
  0xa5   : > { %739 = vrot.lane.b32.xlu1 %v733_v7, %s1240_s29 }
  0xa7   : > { %410 = vrot.lane.b32.xlu0 %v401_v8, %s1238_s27 }
  0xa9   : > { %815 = vrot.lane.b32.xlu1 %v806_v9, %s1244_s14 }
  0xab   : > { %817 = vrot.lane.b32.xlu0 %v814_v12, %s1244_s14 }
  0xad   : > { %819 = vrot.lane.b32.xlu1 %v813_v18, %s1244_s14  ;;  %s982_s14 = sshll.u32 %s136_s8, 4  ;;  %s1450_s14 = int_to_ptr.vmem [resolvable:$true] %s982_s14 }
  0xae   : > { %s1170_s22 = scalar_lea.vmem %s1450_s14, 128  ;;  %p1177_p0 = scmp.lt.s32.totalorder %s1450_s14, %s1175_s24 }
  0xaf   : > { %414 = vrot.lane.b32.xlu0 %v408_v22, %s1238_s27  ;;  %p1171_p11 = scmp.ne.s32.totalorder %s1450_s14, %s1170_s22  ;;  %p1178_p1 = scmp.lt.s32.totalorder %s1176_s25, %s1170_s22 }
  0xb1   : > { %412 = vrot.lane.b32.xlu1 %v409_v24, %s1238_s27  ;;  %p1172_p12 = pnand %p1171_p11, %p1299_p5  ;;  %p1179_p2 = por %p1178_p1, %p1177_p0 }
  0xb3   : > { %498 = vrot.lane.b32.xlu0 %v489_v25, %s1237_s26  ;;  %p1173_p13 = pneg %p1172_p12 }
  0xb5   : > { %902 = vrot.lane.b32.xlu1 %v893_v27, %s1239_s28  ;;  %p1180_p3 = pnand %p1179_p2, %p1173_p13 }
  0xb7   : > { %502 = vrot.lane.b32.xlu0 %v496_v28, %s1237_s26 }
  0xb9   : > { %500 = vrot.lane.b32.xlu1 %v497_v30, %s1237_s26 }
  0xbb   : > { %904 = vrot.lane.b32.xlu0 %v901_v31, %s1239_s28 }
  0xbd   : > { %906 = vrot.lane.b32.xlu1 %v900_v32, %s1239_s28 }
 0x107   : > { %v650_v33 = vpop.permute.xlu1 %649 }
 0x109   : > { %v652_v34 = vpop.permute.xlu0 %651 }
 0x10a   : > { %v655_v35 = vsel %vm475_vm11, %v650_v33, %v652_v34 }
 0x10b   : > { %v654_v36 = vpop.permute.xlu1 %653  ;;  %v661_v38 = vsel %vm249_vm4, %v655_v35, 0 }
 0x10c   : > { %v656_v37 = vsel %vm475_vm11, %v652_v34, %v654_v36 }
 0x10d   : > { %1070 = vmatprep.subr.msk.bf16.mxu0 %vm249_vm4, %v656_v37  ;;  %v315_v39 = vpop.permute.xlu0 %314 }
 0x10e   : > { %667 = vmatpush1.bf16.msra.mxu0 %v661_v38 }
 0x10f   : > { %v736_v13 = vpop.permute.xlu1 %735 }
 0x111   : > { %1071 = vmatmul.mubr.msk.bf16.vlgmr.msra.gmra.mrb[0].mxu0 %vm245_vm5, %v1069_v40  ;;  %v319_v41 = vpop.permute.xlu0 %318 }
 0x112   : > { %784 = vmatprep.mubr.bf16.mxu0 %v1235_v4 }
 0x113   : > { %v317_v42 = vpop.permute.xlu1 %316 }
 0x114   : > { %v321_v43 = vsel %vm320_vm12, %v315_v39, %v317_v42  ;;  %v322_v44 = vsel %vm320_vm12, %v317_v42, %v319_v41 }
 0x115   : > { %v327_v45 = vsel %vm249_vm4, %v321_v43, 0  ;;  %1056 = vmatprep.subr.msk.bf16.mxu1 %vm249_vm4, %v322_v44  ;;  %v738_v46 = vpop.permute.xlu0 %737 }
 0x116   : > { %v741_v47 = vsel %vm387_vm10, %v736_v13, %v738_v46  ;;  %333 = vmatpush1.bf16.msra.mxu1 %v327_v45 }
 0x117   : > { %v740_v49 = vpop.permute.xlu1 %739  ;;  %v747_v51 = vsel %vm249_vm4, %v741_v47, 0 }
 0x118   : > { %v742_v50 = vsel %vm387_vm10, %v738_v46, %v740_v49 }
 0x119   : > { %1073 = vmatprep.subr.msk.bf16.mxu0 %vm249_vm4, %v742_v50  ;;  %v411_v52 = vpop.permute.xlu0 %410  ;;  %1057 = vmatmul.mubr.msk.bf16.vlgmr.msra.gmra.mrb[0].mxu1 %vm245_vm5, %v216_v48 }
 0x11a   : > { %753 = vmatpush1.bf16.msra.mxu0 %v747_v51  ;;  %460 = vmatprep.mubr.bf16.mxu1 %v1235_v4 }
 0x11b   : > { %v816_v54 = vpop.permute.xlu1 %815 }
 0x11d   : > { %1074 = vmatmul.mubr.msk.bf16.vlgmr.msra.gmra.mrb[0].mxu0 %vm245_vm5, %v1072_v53  ;;  %v818_v55 = vpop.permute.xlu0 %817 }
 0x11e   : > { %v822_v56 = vsel %vm821_vm13, %v816_v54, %v818_v55  ;;  %865 = vmatprep.mubr.bf16.mxu0 %v1235_v4 }
 0x11f   : > { %v820_v57 = vpop.permute.xlu1 %819  ;;  %v828_v59 = vsel %vm249_vm4, %v822_v56, 0 }
 0x120   : > { %v823_v58 = vsel %vm821_vm13, %v818_v55, %v820_v57 }
 0x121   : > { %1076 = vmatprep.subr.msk.bf16.mxu0 %vm249_vm4, %v823_v58  ;;  %v415_v60 = vpop.permute.xlu0 %414 }
 0x122   : > { %834 = vmatpush1.bf16.msra.mxu0 %v828_v59 }
 0x123   : > { %v413_v61 = vpop.permute.xlu1 %412 }
 0x124   : > { %v417_v62 = vsel %vm416_vm7, %v411_v52, %v413_v61  ;;  %v418_v63 = vsel %vm416_vm7, %v413_v61, %v415_v60 }
 0x125   : > { %v423_v0 = vsel %vm249_vm4, %v417_v62, 0  ;;  %1060 = vmatprep.subr.msk.bf16.mxu1 %vm249_vm4, %v418_v63  ;;  %v499_v1 = vpop.permute.xlu0 %498 }
 0x126   : > { %429 = vmatpush1.bf16.msra.mxu1 %v423_v0 }
 0x127   : > { %v903_v5 = vpop.permute.xlu1 %902 }
 0x129   : > { %1061 = vmatmul.mubr.msk.bf16.vlgmr.msra.gmra.mrb[0].mxu1 %vm245_vm5, %v1059_v2  ;;  %1077 = vmatmul.mubr.msk.bf16.vlgmr.msra.gmra.mrb[0].mxu0 %vm245_vm5, %v1075_v3  ;;  %v503_v6 = vpop.permute.xlu0 %502 }
 0x12a   : > { %548 = vmatprep.mubr.bf16.mxu1 %v1235_v4  ;;  %951 = vmatprep.mubr.bf16.mxu0 %v1235_v4 }
 0x12b   : > { %v501_v7 = vpop.permute.xlu1 %500 }
 0x12c   : > { %v505_v8 = vsel %vm504_vm6, %v499_v1, %v501_v7  ;;  %v506_v9 = vsel %vm504_vm6, %v501_v7, %v503_v6 }
 0x12d   : > { %v511_v10 = vsel %vm249_vm4, %v505_v8, 0  ;;  %1063 = vmatprep.subr.msk.bf16.mxu1 %vm249_vm4, %v506_v9  ;;  %v905_v11 = vpop.permute.xlu0 %904 }
 0x12e   : > { %v908_v12 = vsel %vm212_vm8, %v903_v5, %v905_v11  ;;  %517 = vmatpush1.bf16.msra.mxu1 %v511_v10 }
 0x12f   : > { %v907_v14 = vpop.permute.xlu1 %906  ;;  %v914_v4 = vsel %vm249_vm4, %v908_v12, 0 }
 0x130   : > { %v909_v15 = vsel %vm212_vm8, %v905_v11, %v907_v14 }
 0x131   : > { %1079 = vmatprep.subr.msk.bf16.mxu0 %vm249_vm4, %v909_v15 }
 0x132   : > { %920 = vmatpush1.bf16.msra.mxu0 %v914_v4 }
 0x135   : > { %1064 = vmatmul.mubr.msk.bf16.vlgmr.msra.gmra.mrb[0].mxu1 %vm245_vm5, %v1062_v16  ;;  %1080 = vmatmul.mubr.msk.bf16.vlgmr.msra.gmra.mrb[0].mxu0 %vm245_vm5, %v1078_v17 }
 0x208   : > { %v550_v18 = vpop.f32.mrb[0].mxu1  ;;  %v953_v19 = vpop.f32.mrb[0].mxu0 }
 0x209   : > { %v1088_v20 = vadd.f32 %v953_v19, %v550_v18  ;;  %v552_v21 = vpop.f32.mrb[1].mxu1  ;;  %v955_v22 = vpop.f32.mrb[1].mxu0 }
 0x20a   : > { %v1089_v23 = vadd.f32 %v955_v22, %v552_v21  ;;  %v554_v24 = vpop.f32.mrb[2].mxu1  ;;  %v957_v25 = vpop.f32.mrb[2].mxu0 }
 0x20b   : > { %v555_v26 = vpop.f32.mrb[3].mxu1  ;;  %v958_v27 = vpop.f32.mrb[3].mxu0 }
 0x20c   : > { %v964_v28 = vcombine.low %v1088_v20, %v1089_v23 }
 0x20e   : > { %966 = vst [vmem:[%s136_s8] sm:$0xff] %v964_v28 }
 0x20f   : > { %1183 = shalt.err (!%p1180_p3)
}
 0x210   : > { %s1184_s26 = scalar_lea.hbm %s1448_s21, 128  ;;  %s1188_s29 = scalar_lea.hbm %s1492_s2, 256 }
 0x211   : > { %p1185_p4 = scmp.ne.s32.totalorder %s1448_s21, %s1184_s26  ;;  %p1189_p9 = scmp.lt.u32.totalorder %s1448_s21, %s1492_s2 }
 0x212   : > { %p1190_p10 = scmp.lt.u32.totalorder %s1188_s29, %s1184_s26  ;;  %p1192_p12 = scmp.lt.u32.totalorder %s1184_s26, %s1448_s21 }
 0x213   : > { %p1186_p7 = pnand %p1185_p4, %p1299_p5 }
 0x214   : > { %p1191_p11 = por %p1190_p10, %p1189_p9 }
 0x215   : > { %p1187_p8 = pneg %p1186_p7 }
 0x216   : > { %p1193_p13 = por %p1192_p12, %p1191_p11 }
 0x218   : > { %p1194_p0 = pnand %p1193_p13, %p1187_p8 }
 0x21a   : > { %1197 = shalt.err (!%p1194_p0)
}
 0x21b   : > { %1118 = dma.vmem_to_hbm [thread:$0]  (%p1299_p5), %s1450_s14, 128, %s1448_s21, %s968_s13  }
 0x21c PF: > { %p1124_p1 = scmp.ge.s32.totalorder %s1232_s12, 2  ;;  %s994_s4 = sand.u32 1, %s1220_s9  }
 0x21d   : > { %s995_s5 = scalar_lea.sflag [#allocation4], %s994_s4 }
 0x21e   : > { %p1121_p2 = pnand %p1124_p1, %p1303_p6 }
 0x220   : > { %1215 = dma.done.wait (!%p1121_p2), %s995_s5, 128  }
 0x221   : > { %1217 = vsyncadd (!%p1121_p2), %s995_s5, 4294967168  ;;  %p12_p3 = scmp.ge.s32.totalorder %s1286_s15, 4   ;;  %s1495_s9 = smov %s1224_s10 }
 0x222   : > { %s1496_s10 = smov %s1228_s11  ;;  %s1497_s11 = smov %s1297_s18 }
 0x223   : > { %s1498_s12 = smov %s1286_s15  ;;  %14 = sbr.rel (!%p12_p3) target bundleno = 3 (0x3), region = 71 }
 0x22a   :  { %1000 = vsyncpa [#allocation4], 1 }
 0x22b   :  { %1002 = vsyncpa [#allocation4 + $0x1], 1 }

</bundles_post_ra>
